<compile_context>
chip_gen: v5e
topology: v5e:2x2
jax: 0.10.0
libtpu: 0.0.40
codegen_flags: <defaults>
</compile_context>

<pallas_src>
import jax
import jax.numpy as jnp
from jax.experimental import pallas as pl
from jax.experimental.pallas import tpu as pltpu

HIDDEN = 128
NEG_SLOPE = 0.01


def _round_up(n, m):
    return ((n + m - 1) // m) * m


def _cdiv(a, b):
    return (a + b - 1) // b


def _vmem_budget_bytes():
    """Per-generation VMEM budget (leave headroom for compiler temporaries)."""
    cap = None
    try:
        cap = getattr(pltpu.get_tpu_info(), "vmem_capacity_bytes", None)
    except Exception:
        cap = None
    if not cap:
        cap = 64 * 1024 * 1024  # conservative default = v7x per-TC physical VMEM
    return min(int(cap * 0.75), 100 * 1024 * 1024)


def _choose_tiling(B, F, x_dtype, block_b, vmem_budget):
    """Pick (tb, nblocks, b_pad): working set fits the VMEM budget, padding
    waste is <= one alignment group per tile, and the grid has >= 2 steps
    (v7x megacore) whenever the batch allows it."""
    x_bytes = jnp.dtype(x_dtype).itemsize
    is_bf16 = jnp.dtype(x_dtype) == jnp.dtype(jnp.bfloat16)
    align = 16 if is_bf16 else 8  # bf16 packs 16 rows per sublane tile

    # Per-row VMEM cost: x double-buffer, in-kernel bf16 copy (f32 path only),
    # f32 intermediates around h, double-buffered (tb, 1) output.
    per_row = 2 * F * x_bytes + (0 if is_bf16 else F * 2) + 4 * HIDDEN * 4 + 2 * 4
    # Resident cost: single-buffered (F, 128) bf16 weight + b1/w2 + slack.
    resident = F * HIDDEN * 2 + 4 * HIDDEN * 4 + 64 * 1024

    avail = max(vmem_budget - resident, align * per_row)
    tb_cap = max(align, (avail // per_row) // align * align)
    tb_cap = min(tb_cap, _round_up(block_b, align))

    nblocks = max(1, _cdiv(B, tb_cap))
    if nblocks == 1 and B >= 2 * align:
        nblocks = 2  # >= 2 grid steps so the "parallel" axis shards both v7x TCs
    tb = _round_up(_cdiv(B, nblocks), align)
    return tb, nblocks, tb * nblocks


def _disc_kernel(x_ref, w1_ref, b1_ref, w2_ref, b2_ref, o_ref):
    # x:  (tb, F) f32|bf16 block     w1: (F, HIDDEN) bf16  (resident, MXU-native)
    # b1: (1, HIDDEN) f32            w2: (1, HIDDEN) f32   (resident)
    # b2: (1,) f32 in SMEM           o:  (tb, 1) f32
    x = x_ref[...]
    if x.dtype != jnp.bfloat16:
        # f32 caller path: cast in-kernel (no extra HBM pass).  bf16 callers skip this.
        x = x.astype(jnp.bfloat16)

    # Linear 1 on the MXU: (tb, F) @ (F, 128), f32 accumulation.
    h = jnp.dot(x, w1_ref[...], preferred_element_type=jnp.float32)
    h = h + b1_ref[...]
    # LeakyReLU(0.01)
    h = jnp.where(h > 0, h, NEG_SLOPE * h)

    # Linear 2 (out_features=1): VPU multiply + lane reduction beats an N=1 matmul.
    logit = jnp.sum(h * w2_ref[...], axis=-1, keepdims=True) + b2_ref[0]

    # Sigmoid: exp + approximate reciprocal ride the EUP slot (kernel is DMA-bound).
    # Clamp so approx-reciprocal error can never produce p > 1 (safe for log/BCE).
    p = pl.reciprocal(1.0 + jnp.exp(-logit), approx=True)
    o_ref[...] = jnp.clip(p, 0.0, 1.0)
    # NOTE: a lane-dense (1, tb) output layout would avoid masked vst.msk stores,
    # but output bytes are negligible here, so we keep the simple (tb, 1) block.


def discriminator_forward(x, w1, b1, w2, b2, *, block_b=1024):
    """Forward pass of the Discriminator.

    x : (B, F) float32 or bfloat16 (bf16 is the fast path: half the HBM traffic).
    w1: (128, F), b1: (128,), w2: (1, 128), b2: (1,)  -- PyTorch Linear layouts.
    Returns (B, 1) float32 probabilities.
    """
    B, F = x.shape
    assert w1.shape == (HIDDEN, F)

    vmem_budget = _vmem_budget_bytes()
    tb, nblocks, b_pad = _choose_tiling(B, F, x.dtype, block_b, vmem_budget)
    if b_pad != B:
        x = jnp.pad(x, ((0, b_pad - B), (0, 0)))

    # One-time transpose to the MXU-native (F, 128) bf16 layout (contraction dim
    # on the RHS sublane axis) -> no per-grid-step weight relayout in the kernel.
    w1t_bf = w1.T.astype(jnp.bfloat16)
    b1_r = b1.reshape(1, HIDDEN).astype(jnp.float32)
    w2_r = w2.reshape(1, HIDDEN).astype(jnp.float32)
    b2_r = b2.reshape(1).astype(jnp.float32)

    resident = pl.Buffered(1)  # constant-index operands: fetched once, single buffer

    out = pl.pallas_call(
        _disc_kernel,
        out_shape=jax.ShapeDtypeStruct((b_pad, 1), jnp.float32),
        grid=(nblocks,),
        in_specs=[
            pl.BlockSpec((tb, F), lambda i: (i, 0)),            # x: streamed
            pl.BlockSpec((F, HIDDEN), lambda i: (0, 0), pipeline_mode=resident),
            pl.BlockSpec((1, HIDDEN), lambda i: (0, 0), pipeline_mode=resident),
            pl.BlockSpec((1, HIDDEN), lambda i: (0, 0), pipeline_mode=resident),
            pl.BlockSpec(memory_space=pltpu.MemorySpace.SMEM),   # b2: scalar in SMEM
        ],
        out_specs=pl.BlockSpec((tb, 1), lambda i: (i, 0)),
        compiler_params=pltpu.CompilerParams(
            dimension_semantics=("parallel",),   # megacore sharding on v7x
            vmem_limit_bytes=vmem_budget,
        ),
    )(x, w1t_bf, b1_r, w2_r, b2_r)

    return out[:B]


def _reference(x, w1, b1, w2, b2):
    h = x @ w1.T + b1
    h = jnp.where(h > 0, h, NEG_SLOPE * h)
    logit = h @ w2.T + b2
    return jax.nn.sigmoid(logit)


if __name__ == "__main__":
    key = jax.random.PRNGKey(0)
    k_x, k_w1, k_b1, k_w2, k_b2 = jax.random.split(key, 5)

    batch = 8
    in_features = 256  # small synthetic flattened-image size

    x = jax.random.normal(k_x, (batch, in_features), dtype=jnp.float32)

    # PyTorch-Linear-like uniform init.
    bound1 = 1.0 / jnp.sqrt(in_features)
    w1 = jax.random.uniform(k_w1, (HIDDEN, in_features), jnp.float32, -bound1, bound1)
    b1 = jax.random.uniform(k_b1, (HIDDEN,), jnp.float32, -bound1, bound1)
    bound2 = 1.0 / jnp.sqrt(HIDDEN)
    w2 = jax.random.uniform(k_w2, (1, HIDDEN), jnp.float32, -bound2, bound2)
    b2 = jax.random.uniform(k_b2, (1,), jnp.float32, -bound2, bound2)

    # f32 path.
    out = jax.block_until_ready(discriminator_forward(x, w1, b1, w2, b2))
    ref = _reference(x, w1, b1, w2, b2)
    assert out.shape == (batch, 1)
    assert jnp.allclose(out, ref, atol=1e-2, rtol=1e-2), "mismatch vs f32 reference"
    assert bool(jnp.all(out >= 0.0)) and bool(jnp.all(out <= 1.0)), "probability out of [0,1]"

    # Ragged-batch padding path (B not a multiple of the tile / alignment).
    x2 = jax.random.normal(k_x, (10, in_features), dtype=jnp.float32)
    out2 = jax.block_until_ready(discriminator_forward(x2, w1, b1, w2, b2))
    ref2 = _reference(x2, w1, b1, w2, b2)
    assert out2.shape == (10, 1)
    assert jnp.allclose(out2, ref2, atol=1e-2, rtol=1e-2), "mismatch (ragged batch)"

    # bf16 fast path (x already bf16: no in-kernel cast, half the HBM traffic).
    xb = x.astype(jnp.bfloat16)
    out3 = jax.block_until_ready(discriminator_forward(xb, w1, b1, w2, b2))
    ref3 = _reference(xb.astype(jnp.float32), w1, b1, w2, b2)
    assert out3.shape == (batch, 1)
    assert jnp.allclose(out3, ref3, atol=1e-2, rtol=1e-2), "mismatch (bf16 fast path)"

    print("KERNEL_OK")
</pallas_src>

<mosaic_0001>
module attributes {stable_mosaic.version = 11 : i64} {
  func.func @_disc_kernel(%arg0: i32, %arg1: memref<8x256xf32, #tpu.memory_space<vmem>>, %arg2: memref<256x128xbf16, #tpu.memory_space<vmem>>, %arg3: memref<1x128xf32, #tpu.memory_space<vmem>>, %arg4: memref<1x128xf32, #tpu.memory_space<vmem>>, %arg5: memref<1xf32, #tpu.memory_space<smem>>, %arg6: memref<8x1xf32, #tpu.memory_space<vmem>>) attributes {dimension_semantics = [#tpu.dimension_semantics<parallel>], iteration_bounds = array<i64: 1>, scalar_prefetch = 0 : i64, scratch_operands = 0 : i64, tpu.core_type = #tpu.core_type<tc>, window_params = [{transform_indices = @transform_0, window_bounds = array<i64: 8, 256>}, {pipeline_mode = #tpu.pipeline_mode<synchronous>, transform_indices = @transform_1, window_bounds = array<i64: 256, 128>}, {pipeline_mode = #tpu.pipeline_mode<synchronous>, transform_indices = @transform_2, window_bounds = array<i64: 1, 128>}, {pipeline_mode = #tpu.pipeline_mode<synchronous>, transform_indices = @transform_3, window_bounds = array<i64: 1, 128>}, {transform_indices = @transform_4, window_bounds = array<i64: 1>}, {transform_indices = @transform_5, window_bounds = array<i64: 8, 1>}]} {
    %c0 = arith.constant 0 : index
    %c0_0 = arith.constant 0 : index
    %0 = vector.load %arg1[%c0, %c0_0] : memref<8x256xf32, #tpu.memory_space<vmem>>, vector<8x256xf32>
    %1 = arith.truncf %0 : vector<8x256xf32> to vector<8x256xbf16>
    %c0_1 = arith.constant 0 : index
    %c0_2 = arith.constant 0 : index
    %2 = vector.load %arg2[%c0_1, %c0_2] : memref<256x128xbf16, #tpu.memory_space<vmem>>, vector<256x128xbf16>
    %cst = arith.constant dense<0.000000e+00> : vector<8x128xf32>
    %3 = tpu.matmul %1, %2, %cst {dimension_numbers = #tpu.dot_dimension_numbers<[1], [0], [0], [1], [0, 0, 1, 1], [], []>} : vector<8x256xbf16>, vector<256x128xbf16>, vector<8x128xf32> -> vector<8x128xf32>
    %c0_3 = arith.constant 0 : index
    %c0_4 = arith.constant 0 : index
    %4 = vector.load %arg3[%c0_3, %c0_4] : memref<1x128xf32, #tpu.memory_space<vmem>>, vector<1x128xf32>
    %5 = vector.broadcast %4 : vector<1x128xf32> to vector<8x128xf32>
    %6 = arith.addf %3, %5 : vector<8x128xf32>
    %cst_5 = arith.constant 0.000000e+00 : f32
    %7 = vector.broadcast %cst_5 : f32 to vector<8x128xf32>
    %8 = arith.cmpf ogt, %6, %7 : vector<8x128xf32>
    %cst_6 = arith.constant 0.00999999977 : f32
    %9 = vector.broadcast %cst_6 : f32 to vector<8x128xf32>
    %10 = arith.mulf %9, %6 : vector<8x128xf32>
    %11 = arith.select %8, %6, %10 : vector<8x128xi1>, vector<8x128xf32>
    %c0_7 = arith.constant 0 : index
    %c0_8 = arith.constant 0 : index
    %12 = vector.load %arg4[%c0_7, %c0_8] : memref<1x128xf32, #tpu.memory_space<vmem>>, vector<1x128xf32>
    %13 = vector.broadcast %12 : vector<1x128xf32> to vector<8x128xf32>
    %14 = arith.mulf %11, %13 : vector<8x128xf32>
    %cst_9 = arith.constant dense<0.000000e+00> : vector<8xf32>
    %15 = vector.multi_reduction <add>, %14, %cst_9 [1] : vector<8x128xf32> to vector<8xf32>
    %16 = vector.shape_cast %15 : vector<8xf32> to vector<8x1xf32>
    %c0_10 = arith.constant 0 : index
    %17 = memref.load %arg5[%c0_10] : memref<1xf32, #tpu.memory_space<smem>>
    %18 = vector.broadcast %17 : f32 to vector<8x1xf32>
    %19 = arith.addf %16, %18 : vector<8x1xf32>
    %cst_11 = arith.constant 0.000000e+00 : f32
    %20 = vector.broadcast %cst_11 : f32 to vector<8x1xf32>
    %21 = arith.subf %20, %19 : vector<8x1xf32>
    %22 = math.exp %21 : vector<8x1xf32>
    %cst_12 = arith.constant 1.000000e+00 : f32
    %23 = vector.broadcast %cst_12 : f32 to vector<8x1xf32>
    %24 = arith.addf %23, %22 : vector<8x1xf32>
    %25 = tpu.reciprocal %24 {approx = true} : vector<8x1xf32> -> vector<8x1xf32>
    %cst_13 = arith.constant 0.000000e+00 : f32
    %cst_14 = arith.constant 1.000000e+00 : f32
    %26 = vector.broadcast %cst_13 : f32 to vector<8x1xf32>
    %27 = arith.maximumf %26, %25 : vector<8x1xf32>
    %28 = vector.broadcast %cst_14 : f32 to vector<8x1xf32>
    %29 = arith.minimumf %28, %27 : vector<8x1xf32>
    %c0_15 = arith.constant 0 : index
    %c0_16 = arith.constant 0 : index
    %30 = vector.load %arg6[%c0_15, %c0_16] : memref<8x1xf32, #tpu.memory_space<vmem>>, vector<8x1xf32>
    tpu.vector_store %arg6[%c0_15, %c0_16], %29 {strides = array<i32>} : memref<8x1xf32, #tpu.memory_space<vmem>>, vector<8x1xf32>,
    return
  }
  func.func @transform_0(%arg0: i32) -> (i32, i32) {
    %c0_i32 = arith.constant 0 : i32
    %c0_i32_0 = arith.constant 0 : i32
    return %arg0, %c0_i32 : i32, i32
  }
  func.func @transform_1(%arg0: i32) -> (i32, i32) {
    %c0_i32 = arith.constant 0 : i32
    %c0_i32_0 = arith.constant 0 : i32
    %c0_i32_1 = arith.constant 0 : i32
    return %c0_i32, %c0_i32_0 : i32, i32
  }
  func.func @transform_2(%arg0: i32) -> (i32, i32) {
    %c0_i32 = arith.constant 0 : i32
    %c0_i32_0 = arith.constant 0 : i32
    %c0_i32_1 = arith.constant 0 : i32
    return %c0_i32, %c0_i32_0 : i32, i32
  }
  func.func @transform_3(%arg0: i32) -> (i32, i32) {
    %c0_i32 = arith.constant 0 : i32
    %c0_i32_0 = arith.constant 0 : i32
    %c0_i32_1 = arith.constant 0 : i32
    return %c0_i32, %c0_i32_0 : i32, i32
  }
  func.func @transform_4(%arg0: i32) -> i32 {
    %c0_i32 = arith.constant 0 : i32
    %c0_i32_0 = arith.constant 0 : i32
    return %c0_i32 : i32
  }
  func.func @transform_5(%arg0: i32) -> (i32, i32) {
    %c0_i32 = arith.constant 0 : i32
    %c0_i32_0 = arith.constant 0 : i32
    return %arg0, %c0_i32 : i32, i32
  }
}

</mosaic_0001>

<bundles_post_ra>
// kernel: tpu_custom_call.1
= control target key start
LH: loop header
LB: loop body
LE: loop exit
PB: predicated region body
PF: predicated region fallthrough
CT: control target
= control target key end

     0   :  { %11 = vsyncpa [#allocation4], 0  ;;  %s435_s0 = inlined_call_operand.hbm [shape: f32[8,256], index: 0, kind: input, shape index: {}]   ;;  %s436_s1 = inlined_call_operand.hbm [shape: bf16[256,128], index: 1, kind: input, shape index: {}]   ;;  %s437_s2 = inlined_call_operand.vmem [shape: f32[1,128], index: 2, kind: input, shape index: {}]   ;;  %s438_s3 = inlined_call_operand.vmem [shape: f32[1,128], index: 3, kind: input, shape index: {}]   ;;  %s439_s4 = inlined_call_operand.<no memory space> [shape: f32[1], index: 4, kind: input, shape index: {}]   ;;  %s440_s5 = inlined_call_operand.vmem [shape: f32[8,1], index: 5, kind: output, shape index: {}]  }
   0x1   :  { %s18_s20 = sshll.u32 %s435_s0, 4  ;;  %s19_s20 = int_to_ptr.hbm [resolvable:$true] %s18_s20 }
   0x2   :  { %12 = vsyncpa [#allocation6], 0  ;;  %s383_s21 = smov [#allocation3]   ;;  %s28_s25 = sshll.u32 %s436_s1, 4  ;;  %s29_s25 = int_to_ptr.hbm [resolvable:$true] %s28_s25 }
   0x3   :  { %s20_s22 = sshll.u32 %s383_s21, 4  ;;  %s384_s26 = smov [#allocation5]   ;;  %s21_s22 = int_to_ptr.vmem [resolvable:$true] %s20_s22 }
   0x4   :  { %23 = dma.hbm_to_vmem [thread:$0]  %s19_s20, 256, %s21_s22, [#allocation4]  }
   0x5   :  { %s30_s27 = sshll.u32 %s384_s26, 4  ;;  %s385_s28 = smov 64   ;;  %s31_s27 = int_to_ptr.vmem [resolvable:$true] %s30_s27 }
   0x6   :  { %s386_s29 = smov 4  }
   0x7   :  { %36 = dma.hbm_to_vmem [thread:$0]  %s29_s25, 2048, %s31_s27, [#allocation6], %s385_s28, %s385_s28, %s386_s29  }
   0x8   :  { %379 = dma.done.wait [#allocation4], 256  }
   0x9   :  { %380 = vsyncadd [#allocation4], 4294967040 }
   0xa   :  { %381 = dma.done.wait [#allocation6], 2048  }
   0xb   :  { %382 = vsyncadd [#allocation6], 4294965248  ;;  %v312_v0 = vld [vmem:[#allocation5 + $0x38] sm:$0xff]  ;;  %v311_v2 = vld [vmem:[#allocation5 + $0x30] sm:$0xff]  ;;  %v224_v31 = vstv %s439_s4  ;;  %vm233_vm1 = vcmask 7168  }
   0xc   :  { %v320_v1 = vld [vmem:[#allocation5 + $0x78] sm:$0xff]  ;;  %187 = vmatpush.bf16.msra.mxu0 %v312_v0  ;;  %v319_v3 = vld [vmem:[#allocation5 + $0x70] sm:$0xff]  ;;  %v310_v4 = vld [vmem:[#allocation5 + $0x28] sm:$0xff] }
   0xd   :  { %200 = vmatpush.bf16.msra.mxu1 %v320_v1  ;;  %v318_v5 = vld [vmem:[#allocation5 + $0x68] sm:$0xff]  ;;  %v309_v6 = vld [vmem:[#allocation5 + $0x20] sm:$0xff]  ;;  %v308_v8 = vld [vmem:[#allocation5 + $0x18] sm:$0xff] }
   0xe   :  { %v317_v7 = vld [vmem:[#allocation5 + $0x60] sm:$0xff]  ;;  %v316_v9 = vld [vmem:[#allocation5 + $0x58] sm:$0xff]  ;;  %v307_v10 = vld [vmem:[#allocation5 + $0x10] sm:$0xff] }
   0xf   :  { %v315_v11 = vld [vmem:[#allocation5 + $0x50] sm:$0xff]  ;;  %v306_v12 = vld [vmem:[#allocation5 + $0x8] sm:$0xff]  ;;  %v305_v14 = vld [vmem:[#allocation5] sm:$0xff] }
  0x10   :  { %188 = vmatpush.bf16.msra.mxu0 %v311_v2  ;;  %v314_v13 = vld [vmem:[#allocation5 + $0x48] sm:$0xff]  ;;  %v313_v15 = vld [vmem:[#allocation5 + $0x40] sm:$0xff]  ;;  %v51_v16 = vld [vmem:[#allocation3] sm:$0xff] }
  0x11   :  { %201 = vmatpush.bf16.msra.mxu1 %v319_v3  ;;  %v52_v17 = vld [vmem:[#allocation3 + $0x8] sm:$0xff]  ;;  %v53_v18 = vpack.c.bf16 %v51_v16, %v51_v16  ;;  %v325_v20 = vld [vmem:[%s437_s2] ss:$0 sm:$0xff] }
  0x12   :  { %v54_v19 = vpack.c.bf16 %v52_v17, %v52_v17  ;;  %v326_v25 = vld [vmem:[%s438_s3] ss:$0 sm:$0xff] }
  0x14   :  { %189 = vmatpush.bf16.msra.mxu0 %v310_v4 }
  0x15   :  { %202 = vmatpush.bf16.msra.mxu1 %v318_v5 }
  0x18   :  { %190 = vmatpush.bf16.msra.mxu0 %v309_v6 }
  0x19   :  { %203 = vmatpush.bf16.msra.mxu1 %v317_v7 }
  0x1c   :  { %191 = vmatpush.bf16.msra.mxu0 %v308_v8 }
  0x1d   :  { %204 = vmatpush.bf16.msra.mxu1 %v316_v9 }
  0x20   :  { %192 = vmatpush.bf16.msra.mxu0 %v307_v10 }
  0x21   :  { %205 = vmatpush.bf16.msra.mxu1 %v315_v11 }
  0x24   :  { %193 = vmatpush.bf16.msra.mxu0 %v306_v12 }
  0x25   :  { %206 = vmatpush.bf16.msra.mxu1 %v314_v13 }
  0x28   :  { %194 = vmatpush.bf16.msra.mxu0 %v305_v14 }
  0x29   :  { %207 = vmatpush.bf16.msra.mxu1 %v313_v15 }
  0x2b   :  { %195 = vmatmul.bf16.vlgmr.msra.gmra.mxu0 %v53_v18 }
  0x2c   :  { %208 = vmatmul.bf16.vlgmr.msra.gmra.mxu1 %v54_v19 }
  0xa8   :  { %v196_v21 = vpop.f32.mrf.mxu0 }
  0xa9   :  { %v209_v22 = vpop.f32.mrf.mxu1  ;;  %v197_v23 = vadd.f32 %v325_v20, %v196_v21 }
  0xab   :  { %v210_v24 = vadd.f32 %v209_v22, %v197_v23 }
  0xad   :  { %v214_v26 = vmul.f32 0.01, %v210_v24  ;;  %vm213_vm0 = vcmp.gt.f32.partialorder %v210_v24, 0.0 }
  0xaf   :  { %v215_v27 = vsel %vm213_vm0, %v210_v24, %v214_v26 }
  0xb0   :  { %v198_v28 = vpop.f32.mrf.mxu0  ;;  %v220_v30 = vmul.f32 %v326_v25, %v215_v27 }
  0xb1   :  { %v211_v29 = vpop.f32.mrf.mxu1 }
  0xb2   :  { %221 = vadd.xlane.f32.xlu0 %v220_v30 }
 0x125   :  { %v222_v32 = vpop.xlane.xlu0 %221 }
 0x126   :  { %v225_v33 = vadd.f32 %v224_v31, %v222_v32 }
 0x128   :  { %v226_v34 = vsub.f32 0.0, %v225_v33 }
 0x12a   :  { %v227_v35 = vmul.f32 1.442695, %v226_v34 }
 0x12c   :  { %327 = vpow2.f32 %v227_v35 }
 0x132   :  { %v328_v36 = vpop.eup %327 }
 0x133   :  { %v229_v37 = vadd.f32 1.0, %v328_v36 }
 0x135   :  { %329 = vrcp.f32 %v229_v37 }
 0x13b   :  { %v330_v38 = vpop.eup %329 }
 0x13c   :  { %v231_v39 = vmax.f32 %v330_v38, 0.0 }
 0x13e   :  { %v232_v40 = vmin.f32 %v231_v39, 1.0 }
 0x140   :  { %234 = vst.msk [vmem:[%s440_s5] sm:$0xff] %vm233_vm1, %v232_v40 }
 0x141   :  { %239 = vsyncpa [#allocation4], 1 }
 0x142   :  { %240 = vsyncpa [#allocation6], 1 }

</bundles_post_ra>
